<compile_context>
chip_gen: v7x
topology: tpu7x:2x2x1
jax: 0.10.0
libtpu: 0.0.40
codegen_flags: <defaults>
</compile_context>

<pallas_src>
import functools

import jax
import jax.numpy as jnp
from jax.experimental import pallas as pl
from jax.experimental.pallas import tpu as pltpu

_VMEM_LIMIT = 48 * 1024 * 1024  # <= v7x's 64 MiB physical; ample on v5e/v6e.


def _round_up(v, m):
    return (v + m - 1) // m * m


def _pick_tile(n_pad, target):
    """Largest multiple of 128 that divides n_pad and is <= target (>= 128)."""
    best = 128
    t = 128
    while t <= min(n_pad, target):
        if n_pad % t == 0:
            best = t
        t += 128
    return best


def gcn_layer1_kernel(xT_ref, adj_ref, w1T_ref, b1_ref, w2T_ref, pT_ref,
                      acc_ref, *, tk):
    """Layer 1, aggregate-first, with layer 2's projection folded in.

    xT_ref  : [f_in, N_pad]    bf16       (s * X)^T, VMEM-resident
    adj_ref : [TK, TN]         int8/bf16  Â^T tile (quantized), (k, j)-indexed
    w1T_ref : [hidden, f_in]   bf16       W1^T, resident
    b1_ref  : [hidden, 1]      f32        bias column, resident
    w2T_ref : [out, hidden]    bf16       s * W2^T, resident (folded layer-2 proj)
    pT_ref  : [out, TN]        bf16       P^T = (s*W2^T) relu(W1^T X^T Â^T + b1)
    acc_ref : [f_in, TN]       f32        accumulator for X^T Â^T
    """
    k = pl.program_id(1)

    @pl.when(k == 0)
    def _init():
        acc_ref[...] = jnp.zeros_like(acc_ref)

    # Exactly one MXU dot per grid step (projection hoisted out of the k loop).
    xk = xT_ref[:, pl.ds(pl.multiple_of(k * tk, tk), tk)]
    acc_ref[...] += jnp.dot(xk, adj_ref[...].astype(jnp.bfloat16),
                            preferred_element_type=jnp.float32)

    @pl.when(k == pl.num_programs(1) - 1)
    def _finalize():
        agg = acc_ref[...]                                  # X^T Â^T tile, f32
        h = jnp.maximum(
            jnp.dot(w1T_ref[...], agg.astype(jnp.bfloat16),
                    preferred_element_type=jnp.float32) + b1_ref[...],
            0.0)                                            # relu(W1^T X^T Â^T + b1)
        # TODO(synk): training-mode dropout would mask h here (eval -> identity).
        pT_ref[...] = jnp.dot(w2T_ref[...], h.astype(jnp.bfloat16),
                              preferred_element_type=jnp.float32
                              ).astype(pT_ref.dtype)


def gcn_layer2_kernel(pT_ref, adj_ref, b2_ref, outT_ref, acc_ref, *, tk):
    """Layer 2: aggregation only (projection already done), + b2 + log_softmax.

    pT_ref  : [out, N_pad]  bf16       (s*W2^T) H^T, VMEM-resident
    adj_ref : [TK, TN]      int8/bf16  Â^T tile (quantized), (k, j)-indexed
    b2_ref  : [out, 1]      f32        bias column, resident
    outT_ref: [out, TN]     f32        log_softmax output^T tile
    acc_ref : [out, TN]     f32        accumulator
    """
    k = pl.program_id(1)

    @pl.when(k == 0)
    def _init():
        acc_ref[...] = jnp.zeros_like(acc_ref)

    pk = pT_ref[:, pl.ds(pl.multiple_of(k * tk, tk), tk)]
    acc_ref[...] += jnp.dot(pk, adj_ref[...].astype(jnp.bfloat16),
                            preferred_element_type=jnp.float32)

    @pl.when(k == pl.num_programs(1) - 1)
    def _finalize():
        z = acc_ref[...] + b2_ref[...]                      # Z^T tile, f32
        m = jnp.max(z, axis=0, keepdims=True)
        zs = z - m
        lse = jnp.log(jnp.sum(jnp.exp(zs), axis=0, keepdims=True))
        outT_ref[...] = (zs - lse).astype(outT_ref.dtype)


def _layer1_call(xT_p, adj_p, w1T, b1c, w2T_s, *, tn, tk):
    f_in, n_pad = xT_p.shape
    hidden = w1T.shape[0]
    out_dim = w2T_s.shape[0]
    grid = (n_pad // tn, n_pad // tk)  # (node tile j, reduction tile k)

    flops = (2 * f_in * n_pad * n_pad
             + 2 * hidden * f_in * n_pad + 2 * out_dim * hidden * n_pad)
    bytes_acc = (adj_p.size * adj_p.dtype.itemsize
                 + xT_p.size * xT_p.dtype.itemsize + out_dim * n_pad * 2)

    return pl.pallas_call(
        functools.partial(gcn_layer1_kernel, tk=tk),
        out_shape=jax.ShapeDtypeStruct((out_dim, n_pad), jnp.bfloat16),
        grid_spec=pltpu.PrefetchScalarGridSpec(
            num_scalar_prefetch=0,
            grid=grid,
            in_specs=[
                pl.BlockSpec((f_in, n_pad), lambda j, k: (0, 0)),    # X^T resident
                pl.BlockSpec((tk, tn), lambda j, k: (k, j)),         # Â^T tile
                pl.BlockSpec((hidden, f_in), lambda j, k: (0, 0)),   # W1^T resident
                pl.BlockSpec((hidden, 1), lambda j, k: (0, 0)),      # b1 resident
                pl.BlockSpec((out_dim, hidden), lambda j, k: (0, 0)),  # s*W2^T res.
            ],
            out_specs=pl.BlockSpec((out_dim, tn), lambda j, k: (0, j)),
            scratch_shapes=[pltpu.VMEM((f_in, tn), jnp.float32)],
        ),
        compiler_params=pltpu.CompilerParams(
            dimension_semantics=("parallel", "arbitrary"),
            vmem_limit_bytes=_VMEM_LIMIT),
        cost_estimate=pl.CostEstimate(flops=int(flops), transcendentals=0,
                                      bytes_accessed=int(bytes_acc)),
    )(xT_p, adj_p, w1T, b1c, w2T_s)


def _layer2_call(pT, adj_p, b2c, *, tn, tk):
    out_dim, n_pad = pT.shape
    grid = (n_pad // tn, n_pad // tk)

    flops = 2 * out_dim * n_pad * n_pad
    transc = 2 * out_dim * n_pad
    bytes_acc = (adj_p.size * adj_p.dtype.itemsize
                 + pT.size * pT.dtype.itemsize + out_dim * n_pad * 4)

    return pl.pallas_call(
        functools.partial(gcn_layer2_kernel, tk=tk),
        out_shape=jax.ShapeDtypeStruct((out_dim, n_pad), jnp.float32),
        grid_spec=pltpu.PrefetchScalarGridSpec(
            num_scalar_prefetch=0,
            grid=grid,
            in_specs=[
                pl.BlockSpec((out_dim, n_pad), lambda j, k: (0, 0)),  # P^T resident
                pl.BlockSpec((tk, tn), lambda j, k: (k, j)),          # Â^T tile
                pl.BlockSpec((out_dim, 1), lambda j, k: (0, 0)),      # b2 resident
            ],
            out_specs=pl.BlockSpec((out_dim, tn), lambda j, k: (0, j)),
            scratch_shapes=[pltpu.VMEM((out_dim, tn), jnp.float32)],
        ),
        compiler_params=pltpu.CompilerParams(
            dimension_semantics=("parallel", "arbitrary"),
            vmem_limit_bytes=_VMEM_LIMIT),
        cost_estimate=pl.CostEstimate(flops=int(flops),
                                      transcendentals=int(transc),
                                      bytes_accessed=int(bytes_acc)),
    )(pT, adj_p, b2c)


def simple_gcn(x, adj, w1, b1, w2, b2, *, quantize_adj=True):
    """Forward pass of SimpleGCN (eval mode). x: [N, F_in], adj: [N, N] = Â."""
    n, f_in = x.shape
    hidden = w1.shape[1]
    out_dim = w2.shape[1]

    # Pad the node axis only to a multiple of 128 (not to the tile) so traffic
    # scales with the real N; zero adjacency rows/cols keep padded nodes inert.
    n_pad = _round_up(n, 128)
    # Asymmetric tiles: big TK (reduction) amortizes the ~0.35us/step overhead;
    # TN capped at n_pad/2 when possible so the parallel j axis has >=2 steps
    # (v7x has 2 TensorCores).  Both must divide n_pad (multiples of 128).
    tn = _pick_tile(n_pad, min(1024, max(128, n_pad // 2)))
    tk = _pick_tile(n_pad, 2048)

    # Kernels compute (X^T @ adj_p); feeding Â^T keeps the math correct even
    # for a non-symmetric (directed) adjacency.
    adjT = adj.T.astype(jnp.float32)
    if quantize_adj:
        # int8 Â with a global scale halves the dominant O(N^2) HBM stream on
        # every generation (dequant to bf16 in-kernel, f32 accumulation kept).
        amax = jnp.max(jnp.abs(adjT))
        s = jnp.where(amax > 0, amax / 127.0, jnp.float32(1.0))
        adj_c = jnp.clip(jnp.round(adjT / s), -127.0, 127.0).astype(jnp.int8)
    else:
        s = jnp.float32(1.0)
        adj_c = adjT.astype(jnp.bfloat16)
    adj_p = jnp.zeros((n_pad, n_pad), adj_c.dtype).at[:n, :n].set(adj_c)

    # The quantization scale s is folded into the streamed bf16 operands
    # (s*X^T for layer 1, s*W2^T for layer 2) so the kernels need no rescale.
    xT_p = jnp.zeros((f_in, n_pad), jnp.bfloat16).at[:, :n].set(
        (x.T * s).astype(jnp.bfloat16))
    w1T = w1.T.astype(jnp.bfloat16)                      # [hidden, f_in]
    b1c = b1.reshape(hidden, 1).astype(jnp.float32)
    w2T_s = (w2.T * s).astype(jnp.bfloat16)              # [out_dim, hidden]
    b2c = b2.reshape(out_dim, 1).astype(jnp.float32)

    # Layer 1 (+ folded layer-2 projection):
    #   P^T = (s*W2^T) relu(W1^T X^T Â^T + b1)           -> [out_dim, n_pad] bf16
    pT = _layer1_call(xT_p, adj_p, w1T, b1c, w2T_s, tn=tn, tk=tk)

    # Layer 2 aggregation + bias + log_softmax over the feature axis:
    #   out^T = log_softmax(P^T Â^T / s + b2, axis=0)    -> [out_dim, n_pad] f32
    outT = _layer2_call(pT, adj_p, b2c, tn=tn, tk=tk)

    # TODO(synk): for real sparse graphs, switch Â to block-sparse tiles with
    # PrefetchScalarGridSpec scalar-prefetched per-j nonzero-tile lists.

    # Cheap layout plumbing back to the PyTorch [N, out_dim] convention.
    return outT[:, :n].T


def normalized_adjacency(edge_index, num_nodes):
    """Dense Â = D^-1/2 (A + I) D^-1/2 from edge_index [2, E] (plain JAX glue)."""
    src = edge_index[0]
    dst = edge_index[1]
    a = jnp.zeros((num_nodes, num_nodes), jnp.float32).at[dst, src].set(1.0)
    a = jnp.minimum(a + jnp.eye(num_nodes, dtype=jnp.float32), 1.0)
    deg = jnp.sum(a, axis=1)
    dinv = jnp.where(deg > 0, 1.0 / jnp.sqrt(deg), 0.0)
    return dinv[:, None] * a * dinv[None, :]


def glorot(key, shape):
    fan_in, fan_out = shape
    limit = jnp.sqrt(6.0 / (fan_in + fan_out))
    return jax.random.uniform(key, shape, jnp.float32, -limit, limit)


def simple_gcn_ref(x, adj, w1, b1, w2, b2):
    """Pure-JAX f32 reference (matches the PyTorch module in eval mode)."""
    h = jnp.maximum(adj @ (x @ w1) + b1, 0.0)
    z = adj @ (h @ w2) + b2
    return jax.nn.log_softmax(z, axis=1)


if __name__ == "__main__":
    num_nodes = 16
    input_dim = 8
    hidden_dim = 16        # fixed by the module: GCNConv(input_dim, 16)
    output_dim = 4

    key = jax.random.PRNGKey(0)
    k_x, k_w1, k_w2 = jax.random.split(key, 3)

    # Node features [N, F_in].
    x = jax.random.normal(k_x, (num_nodes, input_dim), jnp.float32)

    # Deterministic undirected ring graph, both edge directions; [2, E].
    src = jnp.arange(num_nodes, dtype=jnp.int32)
    dst = (src + 1) % num_nodes
    edge_index = jnp.stack(
        [jnp.concatenate([src, dst]), jnp.concatenate([dst, src])], axis=0)

    # Parameters (GCNConv: glorot weight, zero bias), deterministic.
    w1 = glorot(k_w1, (input_dim, hidden_dim))
    b1 = jnp.zeros((1, hidden_dim), jnp.float32)
    w2 = glorot(k_w2, (hidden_dim, output_dim))
    b2 = jnp.zeros((1, output_dim), jnp.float32)

    adj = normalized_adjacency(edge_index, num_nodes)

    out = simple_gcn(x, adj, w1, b1, w2, b2)
    out = jax.block_until_ready(out)

    assert out.shape == (num_nodes, output_dim)
    # rows of log_softmax must exponentiate-sum to 1
    assert jnp.allclose(jnp.sum(jnp.exp(out), axis=1), 1.0, atol=1e-4)
    # bf16 MXU inputs + int8 Â -> loose tolerance vs the f32 reference
    ref = simple_gcn_ref(x, adj, w1, b1, w2, b2)
    assert jnp.allclose(out, ref, atol=1e-1), float(jnp.max(jnp.abs(out - ref)))
    print("KERNEL_OK")
</pallas_src>

<mosaic_0001>
module attributes {stable_mosaic.version = 11 : i64} {
  func.func @gcn_layer1_kernel(%arg0: i32, %arg1: i32, %arg2: memref<8x128xbf16, #tpu.memory_space<vmem>>, %arg3: memref<128x128xi8, #tpu.memory_space<vmem>>, %arg4: memref<16x8xbf16, #tpu.memory_space<vmem>>, %arg5: memref<16x1xf32, #tpu.memory_space<vmem>>, %arg6: memref<4x16xbf16, #tpu.memory_space<vmem>>, %arg7: memref<4x128xbf16, #tpu.memory_space<vmem>>, %arg8: memref<8x128xf32, #tpu.memory_space<vmem>>) attributes {dimension_semantics = [#tpu.dimension_semantics<parallel>, #tpu.dimension_semantics<arbitrary>], iteration_bounds = array<i64: 1, 1>, scalar_prefetch = 0 : i64, scratch_operands = 1 : i64, tpu.core_type = #tpu.core_type<tc>, window_params = [{pipeline_mode = #tpu.pipeline_mode<synchronous>, transform_indices = @transform_0, window_bounds = array<i64: 8, 128>}, {transform_indices = @transform_1, window_bounds = array<i64: 128, 128>}, {pipeline_mode = #tpu.pipeline_mode<synchronous>, transform_indices = @transform_2, window_bounds = array<i64: 16, 8>}, {pipeline_mode = #tpu.pipeline_mode<synchronous>, transform_indices = @transform_3, window_bounds = array<i64: 16, 1>}, {pipeline_mode = #tpu.pipeline_mode<synchronous>, transform_indices = @transform_4, window_bounds = array<i64: 4, 16>}, {transform_indices = @transform_5, window_bounds = array<i64: 4, 128>}]} {
    %c0_i32 = arith.constant 0 : i32
    %0 = arith.cmpi eq, %arg1, %c0_i32 : i32
    %1 = arith.extui %0 : i1 to i32
    %c0_i32_0 = arith.constant 0 : i32
    %2 = arith.cmpi ne, %1, %c0_i32_0 : i32
    scf.if %2 {
      %cst_9 = arith.constant 0.000000e+00 : f32
      %16 = vector.broadcast %cst_9 : f32 to vector<8x128xf32>
      %c0_10 = arith.constant 0 : index
      %c0_11 = arith.constant 0 : index
      %17 = vector.load %arg8[%c0_10, %c0_11] : memref<8x128xf32, #tpu.memory_space<vmem>>, vector<8x128xf32>
      tpu.vector_store %arg8[%c0_10, %c0_11], %16 {strides = array<i32>} : memref<8x128xf32, #tpu.memory_space<vmem>>, vector<8x128xf32>,
    } else {
    }
    %c128_i32 = arith.constant 128 : i32
    %3 = arith.muli %arg1, %c128_i32 : i32
    %4 = tpu.assume_multiple %3, 128 : i32
    %c0 = arith.constant 0 : index
    %5 = arith.index_cast %4 : i32 to index
    %6 = vector.load %arg2[%c0, %5] : memref<8x128xbf16, #tpu.memory_space<vmem>>, vector<8x128xbf16>
    %c0_1 = arith.constant 0 : index
    %c0_2 = arith.constant 0 : index
    %7 = vector.load %arg8[%c0_1, %c0_2] : memref<8x128xf32, #tpu.memory_space<vmem>>, vector<8x128xf32>
    %c0_3 = arith.constant 0 : index
    %c0_4 = arith.constant 0 : index
    %8 = vector.load %arg3[%c0_3, %c0_4] : memref<128x128xi8, #tpu.memory_space<vmem>>, vector<128x128xi8>
    %9 = arith.sitofp %8 : vector<128x128xi8> to vector<128x128xbf16>
    %cst = arith.constant dense<0.000000e+00> : vector<8x128xf32>
    %10 = tpu.matmul %6, %9, %cst {dimension_numbers = #tpu.dot_dimension_numbers<[1], [0], [0], [1], [0, 0, 1, 1], [], []>} : vector<8x128xbf16>, vector<128x128xbf16>, vector<8x128xf32> -> vector<8x128xf32>
    %11 = arith.addf %7, %10 : vector<8x128xf32>
    %c0_5 = arith.constant 0 : index
    %c0_6 = arith.constant 0 : index
    %12 = vector.load %arg8[%c0_5, %c0_6] : memref<8x128xf32, #tpu.memory_space<vmem>>, vector<8x128xf32>
    tpu.vector_store %arg8[%c0_5, %c0_6], %11 {strides = array<i32>} : memref<8x128xf32, #tpu.memory_space<vmem>>, vector<8x128xf32>,
    %c0_i32_7 = arith.constant 0 : i32
    %13 = arith.cmpi eq, %arg1, %c0_i32_7 : i32
    %14 = arith.extui %13 : i1 to i32
    %c0_i32_8 = arith.constant 0 : i32
    %15 = arith.cmpi ne, %14, %c0_i32_8 : i32
    scf.if %15 {
      %c0_9 = arith.constant 0 : index
      %c0_10 = arith.constant 0 : index
      %16 = vector.load %arg8[%c0_9, %c0_10] : memref<8x128xf32, #tpu.memory_space<vmem>>, vector<8x128xf32>
      %c0_11 = arith.constant 0 : index
      %c0_12 = arith.constant 0 : index
      %17 = vector.load %arg4[%c0_11, %c0_12] : memref<16x8xbf16, #tpu.memory_space<vmem>>, vector<16x8xbf16>
      %18 = arith.truncf %16 : vector<8x128xf32> to vector<8x128xbf16>
      %cst_13 = arith.constant dense<0.000000e+00> : vector<16x128xf32>
      %19 = tpu.matmul %17, %18, %cst_13 {dimension_numbers = #tpu.dot_dimension_numbers<[1], [0], [0], [1], [0, 0, 1, 1], [], []>} : vector<16x8xbf16>, vector<8x128xbf16>, vector<16x128xf32> -> vector<16x128xf32>
      %c0_14 = arith.constant 0 : index
      %c0_15 = arith.constant 0 : index
      %20 = vector.load %arg5[%c0_14, %c0_15] : memref<16x1xf32, #tpu.memory_space<vmem>>, vector<16x1xf32>
      %21 = vector.broadcast %20 : vector<16x1xf32> to vector<16x128xf32>
      %22 = arith.addf %19, %21 : vector<16x128xf32>
      %cst_16 = arith.constant 0.000000e+00 : f32
      %23 = vector.broadcast %cst_16 : f32 to vector<16x128xf32>
      %24 = arith.maximumf %22, %23 : vector<16x128xf32>
      %c0_17 = arith.constant 0 : index
      %c0_18 = arith.constant 0 : index
      %25 = vector.load %arg6[%c0_17, %c0_18] : memref<4x16xbf16, #tpu.memory_space<vmem>>, vector<4x16xbf16>
      %26 = arith.truncf %24 : vector<16x128xf32> to vector<16x128xbf16>
      %cst_19 = arith.constant dense<0.000000e+00> : vector<4x128xf32>
      %27 = tpu.matmul %25, %26, %cst_19 {dimension_numbers = #tpu.dot_dimension_numbers<[1], [0], [0], [1], [0, 0, 1, 1], [], []>} : vector<4x16xbf16>, vector<16x128xbf16>, vector<4x128xf32> -> vector<4x128xf32>
      %28 = arith.truncf %27 : vector<4x128xf32> to vector<4x128xbf16>
      %c0_20 = arith.constant 0 : index
      %c0_21 = arith.constant 0 : index
      %29 = vector.load %arg7[%c0_20, %c0_21] : memref<4x128xbf16, #tpu.memory_space<vmem>>, vector<4x128xbf16>
      tpu.vector_store %arg7[%c0_20, %c0_21], %28 {strides = array<i32>} : memref<4x128xbf16, #tpu.memory_space<vmem>>, vector<4x128xbf16>,
    } else {
    }
    return
  }
  func.func @transform_0(%arg0: i32, %arg1: i32) -> (i32, i32) {
    %c0_i32 = arith.constant 0 : i32
    %c0_i32_0 = arith.constant 0 : i32
    %c0_i32_1 = arith.constant 0 : i32
    return %c0_i32, %c0_i32_0 : i32, i32
  }
  func.func @transform_1(%arg0: i32, %arg1: i32) -> (i32, i32) {
    %c0_i32 = arith.constant 0 : i32
    return %arg1, %arg0 : i32, i32
  }
  func.func @transform_2(%arg0: i32, %arg1: i32) -> (i32, i32) {
    %c0_i32 = arith.constant 0 : i32
    %c0_i32_0 = arith.constant 0 : i32
    %c0_i32_1 = arith.constant 0 : i32
    return %c0_i32, %c0_i32_0 : i32, i32
  }
  func.func @transform_3(%arg0: i32, %arg1: i32) -> (i32, i32) {
    %c0_i32 = arith.constant 0 : i32
    %c0_i32_0 = arith.constant 0 : i32
    %c0_i32_1 = arith.constant 0 : i32
    return %c0_i32, %c0_i32_0 : i32, i32
  }
  func.func @transform_4(%arg0: i32, %arg1: i32) -> (i32, i32) {
    %c0_i32 = arith.constant 0 : i32
    %c0_i32_0 = arith.constant 0 : i32
    %c0_i32_1 = arith.constant 0 : i32
    return %c0_i32, %c0_i32_0 : i32, i32
  }
  func.func @transform_5(%arg0: i32, %arg1: i32) -> (i32, i32) {
    %c0_i32 = arith.constant 0 : i32
    %c0_i32_0 = arith.constant 0 : i32
    return %c0_i32, %arg0 : i32, i32
  }
}

</mosaic_0001>

<bundles_post_ra>
// kernel: tpu_custom_call.1
= control target key start
LH: loop header
LB: loop body
LE: loop exit
PB: predicated region body
PF: predicated region fallthrough
CT: control target
= control target key end

     0   :  { %10 = vsyncpa [#allocation4], 0  ;;  %s429_s0 = inlined_call_operand.hbm [shape: bf16[8,128], index: 0, kind: input, shape index: {}]   ;;  %s430_s1 = inlined_call_operand.vmem [shape: s8[128,128], index: 1, kind: input, shape index: {}]   ;;  %s431_s2 = inlined_call_operand.vmem [shape: bf16[16,8], index: 2, kind: input, shape index: {}]   ;;  %s432_s3 = inlined_call_operand.vmem [shape: f32[16,1], index: 3, kind: input, shape index: {}]   ;;  %s433_s4 = inlined_call_operand.vmem [shape: bf16[4,16], index: 4, kind: input, shape index: {}]   ;;  %s434_s5 = inlined_call_operand.hbm [shape: bf16[4,128], index: 5, kind: output, shape index: {}]  }
   0x1   :  { %11 = vsyncpa [#allocation5], 0  ;;  %s343_s18 = smov [#allocation3]   ;;  %s295_s22 = scalar_lea.hbm %s429_s0, 64 }
   0x2   :  { %s18_s19 = sshll.u32 %s343_s18, 4  ;;  %p296_p0 = scmp.ne.s32.totalorder %s429_s0, %s295_s22  ;;  %s19_s19 = int_to_ptr.vmem [resolvable:$true] %s18_s19 }
   0x3   :  { %p299_p1 = scmp.lt.u32.totalorder %s295_s22, %s429_s0 }
   0x5   :  { %p301_p2 = pnand %p299_p1, %p296_p0 }
   0x7   :  { %304 = shalt.err (!%p301_p2)
}
   0x8   :  { %s305_s27 = scalar_lea.vmem %s19_s19, 64  ;;  %p310_p4 = scmp.lt.s32.totalorder %s19_s19, %s19_s19 }
   0x9   :  { %p306_p3 = scmp.ne.s32.totalorder %s19_s19, %s305_s27  ;;  %p311_p5 = scmp.lt.s32.totalorder %s305_s27, %s305_s27 }
   0xb   :  { %p312_p6 = por %p311_p5, %p310_p4 }
   0xd   :  { %p313_p7 = pnand %p312_p6, %p306_p3 }
   0xf   :  { %316 = shalt.err (!%p313_p7)
}
  0x10   :  { %21 = dma.hbm_to_vmem [thread:$0]  %s429_s0, 64, %s19_s19, [#allocation4]  }
  0x11   :  { %339 = dma.done.wait [#allocation4], 64  }
  0x12   :  { %340 = vsyncadd [#allocation4], 4294967232  ;;  %v344_v0 = vmov 0.0   ;;  %vm345_vm0 = vmmov 0   ;;  %v46_v1 = vld [vmem:[%s430_s1] sm:$0xff]  ;;  %v47_v4 = vld [vmem:[%s430_s1 + $0x8] sm:$0xff] }
  0x13   :  { %256 = vmatprep.subr.bf16.mxu0 %v344_v0  ;;  %272 = vmatprep.mubr.msk.bf16.mxu0 %vm345_vm0, %v344_v0  ;;  %v50_v2 = vunpack.c.l.s8.bf16 %v46_v1  ;;  %v51_v3 = vunpack.c.h.s8.bf16 %v46_v1  ;;  %v52_v5 = vunpack.c.l.s8.bf16 %v47_v4  ;;  %v53_v6 = vunpack.c.h.s8.bf16 %v47_v4  ;;  %v48_v7 = vld [vmem:[%s430_s1 + $0x10] sm:$0xff]  ;;  %v49_v10 = vld [vmem:[%s430_s1 + $0x18] sm:$0xff]  ;;  %v44_v13 = vld [vmem:[#allocation3] sm:$0xf]  ;;  %s347_s17 = smov [#allocation6]  }
  0x14   :  { %276 = vmatprep.subr.bf16.mxu1 %v344_v0  ;;  %278 = vmatprep.mubr.msk.bf16.mxu1 %vm345_vm0, %v344_v0  ;;  %v54_v8 = vunpack.c.l.s8.bf16 %v48_v7  ;;  %v55_v9 = vunpack.c.h.s8.bf16 %v48_v7  ;;  %v56_v11 = vunpack.c.l.s8.bf16 %v49_v10  ;;  %v57_v12 = vunpack.c.h.s8.bf16 %v49_v10  ;;  %v107_v14 = vld [vmem:[%s432_s3] sm:$0xff]  ;;  %v108_v16 = vld [vmem:[%s432_s3 + $0x8] sm:$0xff]  ;;  %s229_s18 = sshll.u32 %s347_s17, 4  ;;  %s230_s18 = int_to_ptr.vmem [resolvable:$true] %s229_s18 }
  0x15   :  { %257 = vmatpush3.bf16.msra.mxu0 %v50_v2  ;;  %v346_v15 = vmov 0   ;;  %vm128_vm1 = vcmask 1043456   ;;  %v294_v23 = vld [vmem:[%s431_s2] sm:$0xff]   ;;  %vm124_vm2 = vcmask 64512   ;;  %vm177_vm3 = vcmask 130048   ;;  %s317_s19 = scalar_lea.vmem %s230_s18, 32  ;;  %p322_p9 = scmp.lt.s32.totalorder %s230_s18, %s230_s18 }
  0x16   :  { %258 = vmatprep.subr.bf16.mxu0 %v344_v0  ;;  %293 = vset.pattern.permute.xlu0 %v346_v15  ;;  %v175_v35 = vld [vmem:[%s433_s4] sm:$0x3]  ;;  %p318_p8 = scmp.ne.s32.totalorder %s230_s18, %s317_s19  ;;  %p323_p10 = scmp.lt.s32.totalorder %s317_s19, %s317_s19 }
  0x17   :  { %111 = vperm.xlu0 %293, %v107_v14  }
  0x18   :  { %p324_p11 = por %p323_p10, %p322_p9 }
  0x19   :  { %259 = vmatpush3.bf16.msra.mxu0 %v51_v3 }
  0x1a   :  { %260 = vmatprep.subr.bf16.mxu0 %v344_v0  ;;  %p325_p12 = pnand %p324_p11, %p318_p8 }
  0x1b   :  { %116 = vperm.xlu0 %293, %v108_v16  }
  0x1d   :  { %261 = vmatpush3.bf16.msra.mxu0 %v52_v5 }
  0x1e   :  { %262 = vmatprep.subr.bf16.mxu0 %v344_v0 }
  0x21   :  { %263 = vmatpush3.bf16.msra.mxu0 %v53_v6 }
  0x22   :  { %264 = vmatprep.subr.bf16.mxu0 %v344_v0 }
  0x25   :  { %265 = vmatpush3.bf16.msra.mxu0 %v54_v8 }
  0x26   :  { %266 = vmatprep.subr.bf16.mxu0 %v344_v0 }
  0x29   :  { %267 = vmatpush3.bf16.msra.mxu0 %v55_v9 }
  0x2a   :  { %268 = vmatprep.subr.bf16.mxu0 %v344_v0 }
  0x2d   :  { %269 = vmatpush3.bf16.msra.mxu0 %v56_v11 }
  0x2e   :  { %270 = vmatprep.subr.bf16.mxu0 %v344_v0 }
  0x31   :  { %271 = vmatpush3.bf16.msra.mxu0 %v57_v12 }
  0x34   :  { %273 = vmatmul.mubr.bf16.vlgmr.msra.gmra.mrb[0].mxu0 %v44_v13 }
  0x96   :  { %v112_v24 = vpop.permute.xlu0 %111 }
  0x9a   :  { %v117_v28 = vpop.permute.xlu0 %116 }
 0x107   :  { %v92_v17 = vpop.f32.mrb[0].mxu0 }
 0x108   :  { %v106_v18 = vpack.c.bf16 %v92_v17, %v92_v17  ;;  %v274_v19 = vpop.f32.mrb[1].mxu0 }
 0x109   :  { %v95_v20 = vpop.f32.mrb[2].mxu0 }
 0x10a   :  { %v275_v21 = vpop.f32.mrb[3].mxu0  ;;  %v130_v22 = vsel %vm128_vm1, %v106_v18, 0 }
 0x10b   :  { %277 = vmatpush3.bf16.msra.mxu1 %v130_v22 }
 0x10c   :  { %282 = vmatprep.subr.bf16.mxu1 %v344_v0 }
 0x10e   :  { %279 = vmatmul.mubr.msk.bf16.vlgmr.msra.gmra.mrb[0].mxu1 %vm124_vm2, %v294_v23 }
 0x10f   :  { %284 = vmatprep.mubr.msk.bf16.mxu1 %vm345_vm0, %v344_v0 }
 0x1e1   :  { %v166_v25 = vpop.f32.mrb[0].mxu1 }
 0x1e2   :  { %v167_v26 = vadd.f32 %v166_v25, %v112_v24  ;;  %v280_v27 = vpop.f32.mrb[1].mxu1 }
 0x1e3   :  { %v169_v29 = vpop.f32.mrb[2].mxu1 }
 0x1e4   :  { %v170_v30 = vadd.f32 %v169_v29, %v117_v28  ;;  %v281_v31 = vpop.f32.mrb[3].mxu1  ;;  %v173_v32 = vmax.f32 %v167_v26, 0.0 }
 0x1e6   :  { %v174_v33 = vmax.f32 %v170_v30, 0.0 }
 0x1e8   :  { %v176_v34 = vpack.c.bf16 %v174_v33, %v173_v32 }
 0x1ea   :  { %283 = vmatpush3.bf16.msra.mxu1 %v176_v34 }
 0x1ed   :  { %285 = vmatmul.mubr.msk.bf16.vlgmr.msra.gmra.mrb[4].mxu1 %vm177_vm3, %v175_v35 }
 0x2c0   :  { %v215_v36 = vpop.f32.mrb[4].mxu1 }
 0x2c1   :  { %v221_v37 = vpack.c.bf16 %v215_v36, %v215_v36  ;;  %v286_v38 = vpop.f32.mrb[5].mxu1 }
 0x2c2   :  { %v218_v39 = vpop.f32.mrb[6].mxu1 }
 0x2c3   :  { %222 = vst [vmem:[#allocation6] sm:$0x3] %v221_v37  ;;  %v287_v40 = vpop.f32.mrb[7].mxu1 }
 0x2c4   :  { %328 = shalt.err (!%p325_p12)
}
 0x2c5   :  { %s329_s21 = scalar_lea.hbm %s434_s5, 32 }
 0x2c6   :  { %p330_p13 = scmp.ne.s32.totalorder %s434_s5, %s329_s21  ;;  %p333_p0 = scmp.lt.u32.totalorder %s329_s21, %s434_s5 }
 0x2c8   :  { %p335_p1 = pnand %p333_p0, %p330_p13 }
 0x2ca   :  { %338 = shalt.err (!%p335_p1)
}
 0x2cb   :  { %232 = dma.vmem_to_hbm [thread:$0]  %s230_s18, 32, %s434_s5, [#allocation5]  }
 0x2cc   :  { %341 = dma.done.wait [#allocation5], 32  }
 0x2cd   :  { %342 = vsyncadd [#allocation5], 4294967264 }
 0x2ce   :  { %236 = vsyncpa [#allocation4], 1 }
 0x2cf   :  { %237 = vsyncpa [#allocation5], 1 }

</bundles_post_ra>
